<compile_context>
chip_gen: v7x
topology: tpu7x:2x2x1
jax: 0.10.0
libtpu: 0.0.40
codegen_flags: <defaults>
</compile_context>

<pallas_src>
import jax
import jax.numpy as jnp
from jax.experimental import pallas as pl
from jax.experimental.pallas import tpu as pltpu

LANE = 128   # padded feature width used for intermediate activations
F_IN = 28    # true input / output feature width

# Original layer dims (weights stored transposed, [in, out]).
DIMS = [(28, 100), (100, 50), (50, 2), (2, 50), (50, 100), (100, 28)]
# After fusing Linear(50,2) @ Linear(2,50) (no nonlinearity in between).
FUSED_DIMS = [(28, 100), (100, 50), (50, 50), (50, 100), (100, 28)]


def autoencoder_kernel(x_ref, w1_ref, wpack_ref, bpack_ref, o_ref):
    """x_ref: [tb, 28] f32. w1_ref: [28, 128] bf16/f32. wpack_ref: [4,128,128].
    bpack_ref: [5,1,128] f32. o_ref: [tb, 28] f32."""
    cd = w1_ref.dtype  # MXU input dtype; accumulation is always f32

    def dense(h, w, bias_idx):
        acc = jnp.dot(h.astype(cd), w, preferred_element_type=jnp.float32)
        return acc + bpack_ref[bias_idx]          # [1,128] broadcast, f32

    x = x_ref[...]                                 # [tb, 28] f32

    h = jnp.maximum(dense(x, w1_ref[...], 0), 0.0)   # Linear(28,100)  + ReLU
    h = jnp.maximum(dense(h, wpack_ref[0], 1), 0.0)  # Linear(100,50)  + ReLU
    h = jnp.maximum(dense(h, wpack_ref[1], 2), 0.0)  # fused 50->2->50 + ReLU
    h = jnp.maximum(dense(h, wpack_ref[2], 3), 0.0)  # Linear(50,100)  + ReLU
    y = jnp.tanh(dense(h, wpack_ref[3], 4))          # Linear(100,28)  + Tanh

    o_ref[...] = y[:, :F_IN].astype(o_ref.dtype)     # masked 28-lane store


def init_params(key):
    """PyTorch-style nn.Linear init; weights stored transposed [in, out]."""
    params = {}
    for i, (fan_in, fan_out) in enumerate(DIMS, start=1):
        key, kw, kb = jax.random.split(key, 3)
        bound = 1.0 / (fan_in ** 0.5)
        params[f"w{i}"] = jax.random.uniform(
            kw, (fan_in, fan_out), jnp.float32, minval=-bound, maxval=bound
        )
        params[f"b{i}"] = jax.random.uniform(
            kb, (1, fan_out), jnp.float32, minval=-bound, maxval=bound
        )
    return params


def fuse_and_pad_params(params, compute_dtype=jnp.bfloat16):
    """Fuse the activation-free bottleneck (w3@w4) and pack weights/biases
    into lane-padded, kernel-ready arrays.  Zero padding keeps the math exact;
    fusion is done in f32 before casting to the compute dtype."""
    w34 = params["w3"] @ params["w4"]                     # (50, 50)
    b34 = params["b3"] @ params["w4"] + params["b4"]      # (1, 50)

    # First layer keeps its true K=28 contraction dim; only N is padded.
    w1 = (
        jnp.zeros((F_IN, LANE), jnp.float32)
        .at[:, : FUSED_DIMS[0][1]]
        .set(params["w1"])
        .astype(compute_dtype)
    )

    packed_ws = [params["w2"], w34, params["w5"], params["w6"]]
    wpack = jnp.zeros((4, LANE, LANE), jnp.float32)
    for i, (w, (fi, fo)) in enumerate(zip(packed_ws, FUSED_DIMS[1:])):
        wpack = wpack.at[i, :fi, :fo].set(w)
    wpack = wpack.astype(compute_dtype)

    packed_bs = [params["b1"], params["b2"], b34, params["b5"], params["b6"]]
    bpack = jnp.zeros((5, 1, LANE), jnp.float32)
    for i, (b, (_, fo)) in enumerate(zip(packed_bs, FUSED_DIMS)):
        bpack = bpack.at[i, :, :fo].set(b)

    return {"w1": w1, "wpack": wpack, "bpack": bpack}


def autoencoder_forward(x, fused_params, *, tb=2048):
    """x: [B, 28] float32.  fused_params: output of fuse_and_pad_params()."""
    B = x.shape[0]
    w1 = fused_params["w1"]
    wpack = fused_params["wpack"]
    bpack = fused_params["bpack"]

    # Batch tile: multiple of 8 sublanes, no larger than the (rounded) batch.
    tb = max(8, min(tb, pl.cdiv(B, 8) * 8))
    # v7x has 2 TensorCores: keep at least 2 grid steps when the batch allows.
    if B >= 16:
        tb = min(tb, pl.cdiv(pl.cdiv(B, 2), 8) * 8)
    b_pad = pl.cdiv(B, tb) * tb

    # Only the batch dim is padded (and only when needed) -- no lane padding.
    xb = x if b_pad == B else jnp.pad(x, ((0, b_pad - B), (0, 0)))

    act_spec = pl.BlockSpec((tb, F_IN), lambda i: (i, 0))   # tiled over batch

    flops = 2 * B * sum(fi * fo for fi, fo in FUSED_DIMS)
    bytes_accessed = (
        B * F_IN * 4 * 2                                   # x in + y out
        + int(w1.size) * w1.dtype.itemsize
        + int(wpack.size) * wpack.dtype.itemsize
        + int(bpack.size) * bpack.dtype.itemsize
    )

    out = pl.pallas_call(
        autoencoder_kernel,
        out_shape=jax.ShapeDtypeStruct((b_pad, F_IN), jnp.float32),
        grid_spec=pltpu.PrefetchScalarGridSpec(
            num_scalar_prefetch=0,
            grid=(b_pad // tb,),
            in_specs=[
                act_spec,                                            # x
                pl.BlockSpec(w1.shape, lambda i: (0, 0)),            # w1
                pl.BlockSpec(wpack.shape, lambda i: (0, 0, 0)),      # wpack
                pl.BlockSpec(bpack.shape, lambda i: (0, 0, 0)),      # bpack
            ],
            out_specs=act_spec,
        ),
        compiler_params=pltpu.CompilerParams(
            dimension_semantics=("parallel",),      # shard batch over v7x TCs
            vmem_limit_bytes=48 << 20,              # fits v7x's 64 MiB VMEM
        ),
        cost_estimate=pl.CostEstimate(
            flops=int(flops),
            transcendentals=int(B * F_IN),
            bytes_accessed=int(bytes_accessed),
        ),
    )(xb, w1, wpack, bpack)

    return out if b_pad == B else out[:B]


def reference_forward(x, params):
    """Plain-JAX reference (original, unfused/unpadded 6-layer params)."""
    h = jnp.maximum(x @ params["w1"] + params["b1"], 0.0)
    h = jnp.maximum(h @ params["w2"] + params["b2"], 0.0)
    z = h @ params["w3"] + params["b3"]
    h = jnp.maximum(z @ params["w4"] + params["b4"], 0.0)
    h = jnp.maximum(h @ params["w5"] + params["b5"], 0.0)
    return jnp.tanh(h @ params["w6"] + params["b6"])


if __name__ == "__main__":
    key = jax.random.PRNGKey(0)
    key_params, key_x = jax.random.split(key)

    params = init_params(key_params)
    # bf16 MXU path (default).  For a strict 1e-5 check use
    # compute_dtype=jnp.float32 instead.
    fused = fuse_and_pad_params(params, compute_dtype=jnp.bfloat16)

    batch = 8
    x = jax.random.normal(key_x, (batch, F_IN), dtype=jnp.float32)

    out = autoencoder_forward(x, fused)
    out = jax.block_until_ready(out)

    ref = reference_forward(x, params)
    assert out.shape == (batch, F_IN), out.shape
    assert jnp.allclose(out, ref, atol=5e-2, rtol=5e-2), (
        "mismatch vs reference: max abs err "
        f"{float(jnp.max(jnp.abs(out - ref)))}"
    )

    print("KERNEL_OK")
</pallas_src>

<mosaic_0001>
module attributes {stable_mosaic.version = 11 : i64} {
  func.func @autoencoder_kernel(%arg0: i32, %arg1: memref<8x28xf32, #tpu.memory_space<vmem>>, %arg2: memref<28x128xbf16, #tpu.memory_space<vmem>>, %arg3: memref<4x128x128xbf16, #tpu.memory_space<vmem>>, %arg4: memref<5x1x128xf32, #tpu.memory_space<vmem>>, %arg5: memref<8x28xf32, #tpu.memory_space<vmem>>) attributes {dimension_semantics = [#tpu.dimension_semantics<parallel>], iteration_bounds = array<i64: 1>, scalar_prefetch = 0 : i64, scratch_operands = 0 : i64, tpu.core_type = #tpu.core_type<tc>, window_params = [{transform_indices = @transform_0, window_bounds = array<i64: 8, 28>}, {pipeline_mode = #tpu.pipeline_mode<synchronous>, transform_indices = @transform_1, window_bounds = array<i64: 28, 128>}, {pipeline_mode = #tpu.pipeline_mode<synchronous>, transform_indices = @transform_2, window_bounds = array<i64: 4, 128, 128>}, {pipeline_mode = #tpu.pipeline_mode<synchronous>, transform_indices = @transform_3, window_bounds = array<i64: 5, 1, 128>}, {transform_indices = @transform_4, window_bounds = array<i64: 8, 28>}]} {
    %c0 = arith.constant 0 : index
    %c0_0 = arith.constant 0 : index
    %0 = vector.load %arg1[%c0, %c0_0] : memref<8x28xf32, #tpu.memory_space<vmem>>, vector<8x28xf32>
    %c0_1 = arith.constant 0 : index
    %c0_2 = arith.constant 0 : index
    %1 = vector.load %arg2[%c0_1, %c0_2] : memref<28x128xbf16, #tpu.memory_space<vmem>>, vector<28x128xbf16>
    %2 = arith.truncf %0 : vector<8x28xf32> to vector<8x28xbf16>
    %cst = arith.constant dense<0.000000e+00> : vector<8x128xf32>
    %3 = tpu.matmul %2, %1, %cst {dimension_numbers = #tpu.dot_dimension_numbers<[1], [0], [0], [1], [0, 0, 1, 1], [], []>} : vector<8x28xbf16>, vector<28x128xbf16>, vector<8x128xf32> -> vector<8x128xf32>
    %c0_3 = arith.constant 0 : index
    %c0_4 = arith.constant 0 : index
    %c0_5 = arith.constant 0 : index
    %4 = vector.load %arg4[%c0_3, %c0_4, %c0_5] : memref<5x1x128xf32, #tpu.memory_space<vmem>>, vector<1x1x128xf32>
    %5 = vector.shape_cast %4 : vector<1x1x128xf32> to vector<1x128xf32>
    %6 = vector.broadcast %5 : vector<1x128xf32> to vector<8x128xf32>
    %7 = arith.addf %3, %6 : vector<8x128xf32>
    %cst_6 = arith.constant 0.000000e+00 : f32
    %8 = vector.broadcast %cst_6 : f32 to vector<8x128xf32>
    %9 = arith.maximumf %7, %8 : vector<8x128xf32>
    %c0_7 = arith.constant 0 : index
    %c0_8 = arith.constant 0 : index
    %c0_9 = arith.constant 0 : index
    %10 = vector.load %arg3[%c0_7, %c0_8, %c0_9] : memref<4x128x128xbf16, #tpu.memory_space<vmem>>, vector<1x128x128xbf16>
    %11 = vector.shape_cast %10 : vector<1x128x128xbf16> to vector<128x128xbf16>
    %12 = arith.truncf %9 : vector<8x128xf32> to vector<8x128xbf16>
    %cst_10 = arith.constant dense<0.000000e+00> : vector<8x128xf32>
    %13 = tpu.matmul %12, %11, %cst_10 {dimension_numbers = #tpu.dot_dimension_numbers<[1], [0], [0], [1], [0, 0, 1, 1], [], []>} : vector<8x128xbf16>, vector<128x128xbf16>, vector<8x128xf32> -> vector<8x128xf32>
    %c1 = arith.constant 1 : index
    %c0_11 = arith.constant 0 : index
    %c0_12 = arith.constant 0 : index
    %14 = vector.load %arg4[%c1, %c0_11, %c0_12] : memref<5x1x128xf32, #tpu.memory_space<vmem>>, vector<1x1x128xf32>
    %15 = vector.shape_cast %14 : vector<1x1x128xf32> to vector<1x128xf32>
    %16 = vector.broadcast %15 : vector<1x128xf32> to vector<8x128xf32>
    %17 = arith.addf %13, %16 : vector<8x128xf32>
    %cst_13 = arith.constant 0.000000e+00 : f32
    %18 = vector.broadcast %cst_13 : f32 to vector<8x128xf32>
    %19 = arith.maximumf %17, %18 : vector<8x128xf32>
    %c1_14 = arith.constant 1 : index
    %c0_15 = arith.constant 0 : index
    %c0_16 = arith.constant 0 : index
    %20 = vector.load %arg3[%c1_14, %c0_15, %c0_16] : memref<4x128x128xbf16, #tpu.memory_space<vmem>>, vector<1x128x128xbf16>
    %21 = vector.shape_cast %20 : vector<1x128x128xbf16> to vector<128x128xbf16>
    %22 = arith.truncf %19 : vector<8x128xf32> to vector<8x128xbf16>
    %cst_17 = arith.constant dense<0.000000e+00> : vector<8x128xf32>
    %23 = tpu.matmul %22, %21, %cst_17 {dimension_numbers = #tpu.dot_dimension_numbers<[1], [0], [0], [1], [0, 0, 1, 1], [], []>} : vector<8x128xbf16>, vector<128x128xbf16>, vector<8x128xf32> -> vector<8x128xf32>
    %c2 = arith.constant 2 : index
    %c0_18 = arith.constant 0 : index
    %c0_19 = arith.constant 0 : index
    %24 = vector.load %arg4[%c2, %c0_18, %c0_19] : memref<5x1x128xf32, #tpu.memory_space<vmem>>, vector<1x1x128xf32>
    %25 = vector.shape_cast %24 : vector<1x1x128xf32> to vector<1x128xf32>
    %26 = vector.broadcast %25 : vector<1x128xf32> to vector<8x128xf32>
    %27 = arith.addf %23, %26 : vector<8x128xf32>
    %cst_20 = arith.constant 0.000000e+00 : f32
    %28 = vector.broadcast %cst_20 : f32 to vector<8x128xf32>
    %29 = arith.maximumf %27, %28 : vector<8x128xf32>
    %c2_21 = arith.constant 2 : index
    %c0_22 = arith.constant 0 : index
    %c0_23 = arith.constant 0 : index
    %30 = vector.load %arg3[%c2_21, %c0_22, %c0_23] : memref<4x128x128xbf16, #tpu.memory_space<vmem>>, vector<1x128x128xbf16>
    %31 = vector.shape_cast %30 : vector<1x128x128xbf16> to vector<128x128xbf16>
    %32 = arith.truncf %29 : vector<8x128xf32> to vector<8x128xbf16>
    %cst_24 = arith.constant dense<0.000000e+00> : vector<8x128xf32>
    %33 = tpu.matmul %32, %31, %cst_24 {dimension_numbers = #tpu.dot_dimension_numbers<[1], [0], [0], [1], [0, 0, 1, 1], [], []>} : vector<8x128xbf16>, vector<128x128xbf16>, vector<8x128xf32> -> vector<8x128xf32>
    %c3 = arith.constant 3 : index
    %c0_25 = arith.constant 0 : index
    %c0_26 = arith.constant 0 : index
    %34 = vector.load %arg4[%c3, %c0_25, %c0_26] : memref<5x1x128xf32, #tpu.memory_space<vmem>>, vector<1x1x128xf32>
    %35 = vector.shape_cast %34 : vector<1x1x128xf32> to vector<1x128xf32>
    %36 = vector.broadcast %35 : vector<1x128xf32> to vector<8x128xf32>
    %37 = arith.addf %33, %36 : vector<8x128xf32>
    %cst_27 = arith.constant 0.000000e+00 : f32
    %38 = vector.broadcast %cst_27 : f32 to vector<8x128xf32>
    %39 = arith.maximumf %37, %38 : vector<8x128xf32>
    %c3_28 = arith.constant 3 : index
    %c0_29 = arith.constant 0 : index
    %c0_30 = arith.constant 0 : index
    %40 = vector.load %arg3[%c3_28, %c0_29, %c0_30] : memref<4x128x128xbf16, #tpu.memory_space<vmem>>, vector<1x128x128xbf16>
    %41 = vector.shape_cast %40 : vector<1x128x128xbf16> to vector<128x128xbf16>
    %42 = arith.truncf %39 : vector<8x128xf32> to vector<8x128xbf16>
    %cst_31 = arith.constant dense<0.000000e+00> : vector<8x128xf32>
    %43 = tpu.matmul %42, %41, %cst_31 {dimension_numbers = #tpu.dot_dimension_numbers<[1], [0], [0], [1], [0, 0, 1, 1], [], []>} : vector<8x128xbf16>, vector<128x128xbf16>, vector<8x128xf32> -> vector<8x128xf32>
    %c4 = arith.constant 4 : index
    %c0_32 = arith.constant 0 : index
    %c0_33 = arith.constant 0 : index
    %44 = vector.load %arg4[%c4, %c0_32, %c0_33] : memref<5x1x128xf32, #tpu.memory_space<vmem>>, vector<1x1x128xf32>
    %45 = vector.shape_cast %44 : vector<1x1x128xf32> to vector<1x128xf32>
    %46 = vector.broadcast %45 : vector<1x128xf32> to vector<8x128xf32>
    %47 = arith.addf %43, %46 : vector<8x128xf32>
    %48 = math.tanh %47 : vector<8x128xf32>
    %49 = vector.extract_strided_slice %48 {offsets = [0, 0], sizes = [8, 28], strides = [1, 1]} : vector<8x128xf32> to vector<8x28xf32>
    %c0_34 = arith.constant 0 : index
    %c0_35 = arith.constant 0 : index
    %50 = vector.load %arg5[%c0_34, %c0_35] : memref<8x28xf32, #tpu.memory_space<vmem>>, vector<8x28xf32>
    tpu.vector_store %arg5[%c0_34, %c0_35], %49 {strides = array<i32>} : memref<8x28xf32, #tpu.memory_space<vmem>>, vector<8x28xf32>,
    return
  }
  func.func @transform_0(%arg0: i32) -> (i32, i32) {
    %c0_i32 = arith.constant 0 : i32
    %c0_i32_0 = arith.constant 0 : i32
    return %arg0, %c0_i32 : i32, i32
  }
  func.func @transform_1(%arg0: i32) -> (i32, i32) {
    %c0_i32 = arith.constant 0 : i32
    %c0_i32_0 = arith.constant 0 : i32
    %c0_i32_1 = arith.constant 0 : i32
    return %c0_i32, %c0_i32_0 : i32, i32
  }
  func.func @transform_2(%arg0: i32) -> (i32, i32, i32) {
    %c0_i32 = arith.constant 0 : i32
    %c0_i32_0 = arith.constant 0 : i32
    %c0_i32_1 = arith.constant 0 : i32
    %c0_i32_2 = arith.constant 0 : i32
    return %c0_i32, %c0_i32_0, %c0_i32_1 : i32, i32, i32
  }
  func.func @transform_3(%arg0: i32) -> (i32, i32, i32) {
    %c0_i32 = arith.constant 0 : i32
    %c0_i32_0 = arith.constant 0 : i32
    %c0_i32_1 = arith.constant 0 : i32
    %c0_i32_2 = arith.constant 0 : i32
    return %c0_i32, %c0_i32_0, %c0_i32_1 : i32, i32, i32
  }
  func.func @transform_4(%arg0: i32) -> (i32, i32) {
    %c0_i32 = arith.constant 0 : i32
    %c0_i32_0 = arith.constant 0 : i32
    return %arg0, %c0_i32 : i32, i32
  }
}

</mosaic_0001>

<bundles_post_ra>
// kernel: tpu_custom_call.1
= control target key start
LH: loop header
LB: loop body
LE: loop exit
PB: predicated region body
PF: predicated region fallthrough
CT: control target
= control target key end

     0   :  { %9 = vsyncpa [#allocation3], 0  ;;  %s1064_s0 = inlined_call_operand.hbm [shape: f32[8,28], index: 0, kind: input, shape index: {}]   ;;  %s1065_s1 = inlined_call_operand.hbm [shape: bf16[28,128], index: 1, kind: input, shape index: {}]   ;;  %s1066_s2 = inlined_call_operand.hbm [shape: bf16[4,128,128], index: 2, kind: input, shape index: {}]   ;;  %s1067_s3 = inlined_call_operand.vmem [shape: f32[5,1,128], index: 3, kind: input, shape index: {}]   ;;  %s1068_s4 = inlined_call_operand.hbm [shape: f32[8,28], index: 4, kind: output, shape index: {}]  }
   0x1   :  { %10 = vsyncpa [#allocation6], 0 }
   0x2   :  { %11 = vsyncpa [#allocation4], 0  ;;  %s916_s15 = smov [#allocation5]   ;;  %s822_s19 = scalar_lea.hbm %s1065_s1, 256 }
   0x3   :  { %s27_s16 = sshll.u32 %s916_s15, 4  ;;  %p823_p0 = scmp.ne.s32.totalorder %s1065_s1, %s822_s19  ;;  %s28_s16 = int_to_ptr.vmem [resolvable:$true] %s27_s16 }
   0x4   :  { %p826_p1 = scmp.lt.u32.totalorder %s822_s19, %s1065_s1 }
   0x6   :  { %p828_p2 = pnand %p826_p1, %p823_p0 }
   0x8   :  { %831 = shalt.err (!%p828_p2)
}
   0x9   :  { %s832_s24 = scalar_lea.vmem %s28_s16, 256  ;;  %p837_p4 = scmp.lt.s32.totalorder %s28_s16, %s28_s16 }
   0xa   :  { %p833_p3 = scmp.ne.s32.totalorder %s28_s16, %s832_s24  ;;  %p838_p5 = scmp.lt.s32.totalorder %s832_s24, %s832_s24 }
   0xc   :  { %p839_p6 = por %p838_p5, %p837_p4 }
   0xe   :  { %p840_p7 = pnand %p839_p6, %p833_p3 }
  0x10   :  { %843 = shalt.err (!%p840_p7)
}
  0x11   :  { %s917_s25 = smov 64   ;;  %s918_s26 = smov 4  }
  0x12   :  { %33 = dma.hbm_to_vmem [thread:$0]  %s1065_s1, 256, %s28_s16, [#allocation6], %s917_s25, %s917_s25, %s918_s26  }
  0x13   :  { %s919_s29 = smov [#allocation2]   ;;  %s920_s5 = smov [#allocation7]  }
  0x14   :  { %s18_s30 = sshll.u32 %s919_s29, 4  ;;  %s39_s6 = sshll.u32 %s920_s5, 4  ;;  %s19_s30 = int_to_ptr.vmem [resolvable:$true] %s18_s30  ;;  %s40_s6 = int_to_ptr.vmem [resolvable:$true] %s39_s6 }
  0x15   :  { %s844_s9 = scalar_lea.hbm %s1064_s0, 128 }
  0x16   :  { %p845_p8 = scmp.ne.s32.totalorder %s1064_s0, %s844_s9  ;;  %p848_p9 = scmp.lt.u32.totalorder %s844_s9, %s1064_s0 }
  0x18   :  { %p850_p10 = pnand %p848_p9, %p845_p8 }
  0x1a   :  { %853 = shalt.err (!%p850_p10)
}
  0x1b   :  { %s854_s1 = scalar_lea.vmem %s19_s30, 128  ;;  %p859_p12 = scmp.lt.s32.totalorder %s19_s30, %s19_s30 }
  0x1c   :  { %p855_p11 = scmp.ne.s32.totalorder %s19_s30, %s854_s1  ;;  %p860_p13 = scmp.lt.s32.totalorder %s854_s1, %s854_s1 }
  0x1e   :  { %p861_p0 = por %p860_p13, %p859_p12 }
  0x20   :  { %p862_p1 = pnand %p861_p0, %p855_p11 }
  0x22   :  { %865 = shalt.err (!%p862_p1)
}
  0x23   :  { %21 = dma.hbm_to_vmem [thread:$0]  %s1064_s0, 128, %s19_s30, [#allocation3]  }
  0x24   :  { %s866_s18 = scalar_lea.hbm %s1066_s2, 4096 }
  0x25   :  { %p867_p2 = scmp.ne.s32.totalorder %s1066_s2, %s866_s18  ;;  %p870_p3 = scmp.lt.u32.totalorder %s866_s18, %s1066_s2 }
  0x27   :  { %p872_p4 = pnand %p870_p3, %p867_p2 }
  0x29   :  { %875 = shalt.err (!%p872_p4)
}
  0x2a   :  { %s876_s23 = scalar_lea.vmem %s40_s6, 4096  ;;  %p881_p6 = scmp.lt.s32.totalorder %s40_s6, %s40_s6 }
  0x2b   :  { %p877_p5 = scmp.ne.s32.totalorder %s40_s6, %s876_s23  ;;  %p882_p7 = scmp.lt.s32.totalorder %s876_s23, %s876_s23 }
  0x2d   :  { %p883_p8 = por %p882_p7, %p881_p6 }
  0x2f   :  { %p884_p9 = pnand %p883_p8, %p877_p5 }
  0x31   :  { %887 = shalt.err (!%p884_p9)
}
  0x32   :  { %45 = dma.hbm_to_vmem [thread:$0]  %s1066_s2, 4096, %s40_s6, [#allocation6], %s917_s25, %s917_s25, %s918_s26  }
  0x33   :  { %910 = dma.done.wait [#allocation3], 128  }
  0x34   :  { %911 = vsyncadd [#allocation3], 4294967168 }
  0x35   :  { %912 = dma.done.wait [#allocation6], 4352  }
  0x36   :  { %913 = vsyncadd [#allocation6], 4294962944  ;;  %v921_v0 = vmov 0.0   ;;  %vm922_vm0 = vmmov 0   ;;  %v786_v1 = vld [vmem:[#allocation5] sm:$0xff]   ;;  %vm86_vm1 = vcmask 1045504  }
  0x37   :  { %690 = vmatprep.subr.bf16.mxu0 %v921_v0  ;;  %694 = vmatprep.mubr.msk.bf16.mxu0 %vm922_vm0, %v921_v0  ;;  %v787_v2 = vld [vmem:[#allocation5 + $0x8] sm:$0x3f]   ;;  %v58_v3 = vld [vmem:[#allocation2] sm:$0xff]  ;;  %v788_v5 = vld [vmem:[#allocation7] sm:$0xff]   ;;  %vm82_vm2 = vcmask 228352   ;;  %s923_s8 = smov [#allocation8]  }
  0x38   :  { %698 = vmatprep.subr.bf16.mxu1 %v921_v0  ;;  %714 = vmatprep.mubr.msk.bf16.mxu1 %vm922_vm0, %v921_v0  ;;  %v88_v4 = vsel %vm86_vm1, %v787_v2, 0  ;;  %v63_v6 = vpack.c.bf16 %v58_v3, %v58_v3  ;;  %v789_v7 = vld [vmem:[#allocation7 + $0x8] sm:$0xff]   ;;  %v790_v8 = vld [vmem:[#allocation7 + $0x10] sm:$0xff]   ;;  %v791_v9 = vld [vmem:[#allocation7 + $0x18] sm:$0xff]   ;;  %s597_s9 = sshll.u32 %s923_s8, 4  ;;  %s598_s9 = int_to_ptr.vmem [resolvable:$true] %s597_s9 }
  0x39   :  { %691 = vmatpush3.bf16.msra.mxu0 %v786_v1  ;;  %699 = vmatpush3.bf16.msra.mxu1 %v788_v5  ;;  %v792_v10 = vld [vmem:[#allocation7 + $0x20] sm:$0xff]   ;;  %v793_v11 = vld [vmem:[#allocation7 + $0x28] sm:$0xff]   ;;  %v794_v12 = vld [vmem:[#allocation7 + $0x30] sm:$0xff]   ;;  %s888_s10 = scalar_lea.vmem %s598_s9, 128  ;;  %p893_p11 = scmp.lt.s32.totalorder %s598_s9, %s598_s9 }
  0x3a   :  { %692 = vmatprep.subr.bf16.mxu0 %v921_v0  ;;  %700 = vmatprep.subr.bf16.mxu1 %v921_v0  ;;  %v795_v13 = vld [vmem:[#allocation7 + $0x38] sm:$0xff]   ;;  %v796_v14 = vld [vmem:[#allocation7 + $0x40] sm:$0xff]   ;;  %v797_v15 = vld [vmem:[#allocation7 + $0x48] sm:$0xff]   ;;  %p889_p10 = scmp.ne.s32.totalorder %s598_s9, %s888_s10  ;;  %p894_p12 = scmp.lt.s32.totalorder %s888_s10, %s888_s10 }
  0x3b   :  { %v798_v16 = vld [vmem:[#allocation7 + $0x50] sm:$0xff]   ;;  %v799_v17 = vld [vmem:[#allocation7 + $0x58] sm:$0xff]   ;;  %v800_v18 = vld [vmem:[#allocation7 + $0x60] sm:$0xff]  }
  0x3c   :  { %v801_v19 = vld [vmem:[#allocation7 + $0x68] sm:$0xff]   ;;  %v802_v28 = vld [vmem:[#allocation7 + $0x70] sm:$0xff]   ;;  %v803_v29 = vld [vmem:[#allocation7 + $0x78] sm:$0xff]   ;;  %p895_p13 = por %p894_p12, %p893_p11 }
  0x3d   :  { %693 = vmatpush3.bf16.msra.mxu0 %v88_v4  ;;  %701 = vmatpush3.bf16.msra.mxu1 %v789_v7  ;;  %v607_v20 = vld [vmem:[%s1067_s3] ss:$0 sm:$0xff]  ;;  %v804_v30 = vld [vmem:[#allocation7 + $0x80] sm:$0xff]   ;;  %v806_v32 = vld [vmem:[#allocation7 + $0x90] sm:$0xff]  }
  0x3e   :  { %718 = vmatprep.subr.bf16.mxu0 %v921_v0  ;;  %702 = vmatprep.subr.bf16.mxu1 %v921_v0  ;;  %v805_v31 = vld [vmem:[#allocation7 + $0x88] sm:$0xff]   ;;  %v807_v33 = vld [vmem:[#allocation7 + $0x98] sm:$0xff]   ;;  %v808_v34 = vld [vmem:[#allocation7 + $0xa0] sm:$0xff]   ;;  %p896_p0 = pnand %p895_p13, %p889_p10 }
  0x3f   :  { %v809_v35 = vld [vmem:[#allocation7 + $0xa8] sm:$0xff]   ;;  %v810_v44 = vld [vmem:[#allocation7 + $0xb0] sm:$0xff]   ;;  %v811_v45 = vld [vmem:[#allocation7 + $0xb8] sm:$0xff]  }
  0x40   :  { %695 = vmatmul.mubr.msk.bf16.vlgmr.msra.gmra.mrb[0].mxu0 %vm82_vm2, %v63_v6  ;;  %v612_v36 = vld [vmem:[%s1067_s3 + $0x1] ss:$0 sm:$0xff]  ;;  %v812_v46 = vld [vmem:[#allocation7 + $0xc0] sm:$0xff]   ;;  %v814_v48 = vld [vmem:[#allocation7 + $0xd0] sm:$0xff]  }
  0x41   :  { %734 = vmatprep.mubr.msk.bf16.mxu0 %vm922_vm0, %v921_v0  ;;  %703 = vmatpush3.bf16.msra.mxu1 %v790_v8  ;;  %v813_v47 = vld [vmem:[#allocation7 + $0xc8] sm:$0xff]   ;;  %v815_v49 = vld [vmem:[#allocation7 + $0xd8] sm:$0xff]   ;;  %v816_v50 = vld [vmem:[#allocation7 + $0xe0] sm:$0xff]  }
  0x42   :  { %704 = vmatprep.subr.bf16.mxu1 %v921_v0  ;;  %719 = vmatpush3.bf16.msra.mxu0 %v796_v14  ;;  %v817_v51 = vld [vmem:[#allocation7 + $0xe8] sm:$0xff]   ;;  %v818_v60 = vld [vmem:[#allocation7 + $0xf0] sm:$0xff]   ;;  %v819_v61 = vld [vmem:[#allocation7 + $0xf8] sm:$0xff]  }
  0x43   :  { %720 = vmatprep.subr.bf16.mxu0 %v921_v0  ;;  %v622_v52 = vld [vmem:[%s1067_s3 + $0x2] ss:$0 sm:$0xff]  ;;  %v632_v62 = vld [vmem:[%s1067_s3 + $0x3] ss:$0 sm:$0xff]  ;;  %v642_v7 = vld [vmem:[%s1067_s3 + $0x4] ss:$0 sm:$0xff] }
  0x45   :  { %705 = vmatpush3.bf16.msra.mxu1 %v791_v9 }
  0x46   :  { %706 = vmatprep.subr.bf16.mxu1 %v921_v0  ;;  %721 = vmatpush3.bf16.msra.mxu0 %v797_v15 }
  0x47   :  { %722 = vmatprep.subr.bf16.mxu0 %v921_v0 }
  0x49   :  { %707 = vmatpush3.bf16.msra.mxu1 %v792_v10 }
  0x4a   :  { %708 = vmatprep.subr.bf16.mxu1 %v921_v0  ;;  %723 = vmatpush3.bf16.msra.mxu0 %v798_v16 }
  0x4b   :  { %724 = vmatprep.subr.bf16.mxu0 %v921_v0 }
  0x4d   :  { %709 = vmatpush3.bf16.msra.mxu1 %v793_v11 }
  0x4e   :  { %710 = vmatprep.subr.bf16.mxu1 %v921_v0  ;;  %725 = vmatpush3.bf16.msra.mxu0 %v799_v17 }
  0x4f   :  { %726 = vmatprep.subr.bf16.mxu0 %v921_v0 }
  0x51   :  { %711 = vmatpush3.bf16.msra.mxu1 %v794_v12 }
  0x52   :  { %712 = vmatprep.subr.bf16.mxu1 %v921_v0  ;;  %727 = vmatpush3.bf16.msra.mxu0 %v800_v18 }
  0x53   :  { %728 = vmatprep.subr.bf16.mxu0 %v921_v0 }
  0x55   :  { %713 = vmatpush3.bf16.msra.mxu1 %v795_v13 }
  0x56   :  { %738 = vmatprep.subr.bf16.mxu1 %v921_v0  ;;  %729 = vmatpush3.bf16.msra.mxu0 %v801_v19 }
  0x57   :  { %730 = vmatprep.subr.bf16.mxu0 %v921_v0 }
  0x5a   :  { %731 = vmatpush3.bf16.msra.mxu0 %v802_v28 }
  0x5b   :  { %732 = vmatprep.subr.bf16.mxu0 %v921_v0 }
  0x5e   :  { %733 = vmatpush3.bf16.msra.mxu0 %v803_v29 }
  0x5f   :  { %758 = vmatprep.subr.bf16.mxu0 %v921_v0 }
 0x113   :  { %v124_v21 = vpop.f32.mrb[0].mxu0 }
 0x114   :  { %v125_v22 = vadd.f32 %v607_v20, %v124_v21  ;;  %v696_v23 = vpop.f32.mrb[1].mxu0 }
 0x115   :  { %v127_v24 = vpop.f32.mrb[2].mxu0 }
 0x116   :  { %v130_v25 = vmax.f32 %v125_v22, 0.0  ;;  %v697_v26 = vpop.f32.mrb[3].mxu0 }
 0x118   :  { %v147_v27 = vpack.c.bf16 %v130_v25, %v130_v25 }
 0x11a   :  { %715 = vmatmul.mubr.bf16.vlgmr.msra.gmra.mrb[0].mxu1 %v147_v27 }
 0x11b   :  { %754 = vmatprep.mubr.msk.bf16.mxu1 %vm922_vm0, %v921_v0  ;;  %739 = vmatpush3.bf16.msra.mxu1 %v804_v30 }
 0x11c   :  { %740 = vmatprep.subr.bf16.mxu1 %v921_v0 }
 0x11f   :  { %741 = vmatpush3.bf16.msra.mxu1 %v805_v31 }
 0x120   :  { %742 = vmatprep.subr.bf16.mxu1 %v921_v0 }
 0x123   :  { %743 = vmatpush3.bf16.msra.mxu1 %v806_v32 }
 0x124   :  { %744 = vmatprep.subr.bf16.mxu1 %v921_v0 }
 0x127   :  { %745 = vmatpush3.bf16.msra.mxu1 %v807_v33 }
 0x128   :  { %746 = vmatprep.subr.bf16.mxu1 %v921_v0 }
 0x12b   :  { %747 = vmatpush3.bf16.msra.mxu1 %v808_v34 }
 0x12c   :  { %748 = vmatprep.subr.bf16.mxu1 %v921_v0 }
 0x12f   :  { %749 = vmatpush3.bf16.msra.mxu1 %v809_v35 }
 0x130   :  { %750 = vmatprep.subr.bf16.mxu1 %v921_v0 }
 0x133   :  { %751 = vmatpush3.bf16.msra.mxu1 %v810_v44 }
 0x134   :  { %752 = vmatprep.subr.bf16.mxu1 %v921_v0 }
 0x137   :  { %753 = vmatpush3.bf16.msra.mxu1 %v811_v45 }
 0x1ed   :  { %v238_v37 = vpop.f32.mrb[0].mxu1 }
 0x1ee   :  { %v239_v38 = vadd.f32 %v612_v36, %v238_v37  ;;  %v716_v39 = vpop.f32.mrb[1].mxu1 }
 0x1ef   :  { %v241_v40 = vpop.f32.mrb[2].mxu1 }
 0x1f0   :  { %v244_v41 = vmax.f32 %v239_v38, 0.0  ;;  %v717_v42 = vpop.f32.mrb[3].mxu1 }
 0x1f2   :  { %v262_v43 = vpack.c.bf16 %v244_v41, %v244_v41 }
 0x1f4   :  { %735 = vmatmul.mubr.bf16.vlgmr.msra.gmra.mrb[4].mxu0 %v262_v43 }
 0x1f5   :  { %774 = vmatprep.mubr.msk.bf16.mxu0 %vm922_vm0, %v921_v0  ;;  %759 = vmatpush3.bf16.msra.mxu0 %v812_v46 }
 0x1f6   :  { %760 = vmatprep.subr.bf16.mxu0 %v921_v0 }
 0x1f9   :  { %761 = vmatpush3.bf16.msra.mxu0 %v813_v47 }
 0x1fa   :  { %762 = vmatprep.subr.bf16.mxu0 %v921_v0 }
 0x1fd   :  { %763 = vmatpush3.bf16.msra.mxu0 %v814_v48 }
 0x1fe   :  { %764 = vmatprep.subr.bf16.mxu0 %v921_v0 }
 0x201   :  { %765 = vmatpush3.bf16.msra.mxu0 %v815_v49 }
 0x202   :  { %766 = vmatprep.subr.bf16.mxu0 %v921_v0 }
 0x205   :  { %767 = vmatpush3.bf16.msra.mxu0 %v816_v50 }
 0x206   :  { %768 = vmatprep.subr.bf16.mxu0 %v921_v0 }
 0x209   :  { %769 = vmatpush3.bf16.msra.mxu0 %v817_v51 }
 0x20a   :  { %770 = vmatprep.subr.bf16.mxu0 %v921_v0 }
 0x20d   :  { %771 = vmatpush3.bf16.msra.mxu0 %v818_v60 }
 0x20e   :  { %772 = vmatprep.subr.bf16.mxu0 %v921_v0 }
 0x211   :  { %773 = vmatpush3.bf16.msra.mxu0 %v819_v61 }
 0x2c7   :  { %v353_v53 = vpop.f32.mrb[4].mxu0 }
 0x2c8   :  { %v354_v54 = vadd.f32 %v622_v52, %v353_v53  ;;  %v736_v55 = vpop.f32.mrb[5].mxu0 }
 0x2c9   :  { %v356_v56 = vpop.f32.mrb[6].mxu0 }
 0x2ca   :  { %v359_v57 = vmax.f32 %v354_v54, 0.0  ;;  %v737_v58 = vpop.f32.mrb[7].mxu0 }
 0x2cc   :  { %v377_v59 = vpack.c.bf16 %v359_v57, %v359_v57 }
 0x2ce   :  { %755 = vmatmul.mubr.bf16.vlgmr.msra.gmra.mrb[4].mxu1 %v377_v59 }
 0x3a1   :  { %v468_v63 = vpop.f32.mrb[4].mxu1 }
 0x3a2   :  { %v469_v1 = vadd.f32 %v632_v62, %v468_v63  ;;  %v756_v2 = vpop.f32.mrb[5].mxu1 }
 0x3a3   :  { %v471_v3 = vpop.f32.mrb[6].mxu1 }
 0x3a4   :  { %v474_v4 = vmax.f32 %v469_v1, 0.0  ;;  %v757_v5 = vpop.f32.mrb[7].mxu1 }
 0x3a6   :  { %v492_v6 = vpack.c.bf16 %v474_v4, %v474_v4 }
 0x3a8   :  { %775 = vmatmul.mubr.bf16.vlgmr.msra.gmra.mrb[8].mxu0 %v492_v6 }
 0x47b   :  { %v583_v8 = vpop.f32.mrb[8].mxu0 }
 0x47c   :  { %v584_v0 = vadd.f32 %v642_v7, %v583_v8  ;;  %v776_v9 = vpop.f32.mrb[9].mxu0 }
 0x47d   :  { %v586_v10 = vpop.f32.mrb[10].mxu0 }
 0x47e   :  { %820 = vtanh.f32 %v584_v0  ;;  %v777_v11 = vpop.f32.mrb[11].mxu0 }
 0x488   :  { %v821_v12 = vpop.eup %820 }
 0x489   :  { %590 = vst.msk [vmem:[#allocation8] sm:$0xff] %vm82_vm2, %v821_v12 }
 0x48a   :  { %899 = shalt.err (!%p896_p0)
}
 0x48b   :  { %s900_s12 = scalar_lea.hbm %s1068_s4, 128 }
 0x48c   :  { %p901_p1 = scmp.ne.s32.totalorder %s1068_s4, %s900_s12  ;;  %p904_p2 = scmp.lt.u32.totalorder %s900_s12, %s1068_s4 }
 0x48e   :  { %p906_p3 = pnand %p904_p2, %p901_p1 }
 0x490   :  { %909 = shalt.err (!%p906_p3)
}
 0x491   :  { %600 = dma.vmem_to_hbm [thread:$0]  %s598_s9, 128, %s1068_s4, [#allocation4]  }
 0x492   :  { %914 = dma.done.wait [#allocation4], 128  }
 0x493   :  { %915 = vsyncadd [#allocation4], 4294967168 }
 0x494   :  { %604 = vsyncpa [#allocation3], 1 }
 0x495   :  { %605 = vsyncpa [#allocation6], 1 }
 0x496   :  { %606 = vsyncpa [#allocation4], 1 }

</bundles_post_ra>
